<compile_context>
chip_gen: v6e
topology: v6e:2x2x1
jax: 0.10.0
libtpu: 0.0.40
codegen_flags: <defaults>
</compile_context>

<pallas_src>
import functools

import jax
import jax.numpy as jnp
from jax.experimental import pallas as pl
from jax.experimental.pallas import tpu as pltpu

GAMMA = 1.5
ALPHA = 0.25
LANES = 128
MAX_TILE_ROWS = 1024  # (1024, 128) f32 tile per input per grid step (~512 KiB)


def _round_up(a, b):
    return (a + b - 1) // b * b


def _focal_loss_kernel(pred_ref, true_ref, out_ref, *,
                       total_n, block_rows, needs_mask, gamma, alpha):
    i = pl.program_id(0)

    x = pred_ref[...].astype(jnp.float32)
    y = true_ref[...].astype(jnp.float32)
    one_minus_y = 1.0 - y

    # Single EUP exp shared between BCE and sigmoid.
    e = jnp.exp(-jnp.abs(x))

    # BCEWithLogitsLoss(reduction='none'), numerically stable form.
    bce = jnp.maximum(x, 0.0) - x * y + jnp.log1p(e)

    # sigmoid(x) = where(x>=0, 1, e) / (1 + e)   with e = exp(-|x|).
    inv = pl.reciprocal(1.0 + e, approx=True)          # EUP slot, ~free
    prob = jnp.where(x >= 0.0, 1.0, e) * inv

    p_t = y * prob + one_minus_y * (1.0 - prob)
    alpha_factor = y * alpha + one_minus_y * (1.0 - alpha)

    # (1 - p_t) ** gamma; clamp guards approx-recip overshoot (t < 0).
    t = jnp.maximum(1.0 - p_t, 0.0)
    if gamma == 1.5:
        modulating_factor = t * jnp.sqrt(t)
    elif gamma == 2.0:
        modulating_factor = t * t
    elif gamma == 1.0:
        modulating_factor = t
    else:
        # Generic pow with a guard so t == 0 never hits log(0).
        safe_t = jnp.maximum(t, 1e-30)
        modulating_factor = jnp.where(t > 0.0, jnp.exp(gamma * jnp.log(safe_t)), 0.0)

    loss = bce * alpha_factor * modulating_factor

    if needs_mask:
        # Mask out zero-padded elements (only emitted when padding exists).
        row_idx = jax.lax.broadcasted_iota(jnp.int32, (block_rows, LANES), 0)
        lane_idx = jax.lax.broadcasted_iota(jnp.int32, (block_rows, LANES), 1)
        flat_idx = (i * block_rows + row_idx) * LANES + lane_idx
        loss = jnp.where(flat_idx < total_n, loss, 0.0)

    # Lane-dense per-block partial sum: (block_rows, 128) -> (8, 128).
    # Pure VPU vreg adds across sublane groups; no cross-lane XLU reduce.
    out_ref[...] = loss.reshape(block_rows // 8, 8, LANES).sum(axis=0)


def focal_loss(pred, true, gamma=GAMMA, alpha=ALPHA):
    """pred (logits) and true: same-shape float arrays. Returns scalar mean loss."""
    assert pred.shape == true.shape
    total_n = pred.size

    pred_flat = pred.reshape(-1)
    true_flat = true.reshape(-1)

    rows = _round_up(total_n, LANES) // LANES
    # Multiple of 16 so bf16 inputs also tile cleanly; cap at MAX_TILE_ROWS.
    block_rows = min(MAX_TILE_ROWS, _round_up(rows, 16))
    padded_rows = _round_up(rows, block_rows)
    padded_elems = padded_rows * LANES
    needs_mask = padded_elems != total_n
    if needs_mask:
        pad = padded_elems - total_n
        pred_flat = jnp.pad(pred_flat, (0, pad))
        true_flat = jnp.pad(true_flat, (0, pad))

    pred2 = pred_flat.reshape(padded_rows, LANES)
    true2 = true_flat.reshape(padded_rows, LANES)
    num_blocks = padded_rows // block_rows

    kernel = functools.partial(
        _focal_loss_kernel,
        total_n=total_n,
        block_rows=block_rows,
        needs_mask=needs_mask,
        gamma=gamma,
        alpha=alpha,
    )

    partial = pl.pallas_call(
        kernel,
        out_shape=jax.ShapeDtypeStruct((num_blocks * 8, LANES), jnp.float32),
        grid_spec=pltpu.PrefetchScalarGridSpec(
            num_scalar_prefetch=0,
            grid=(num_blocks,),
            in_specs=[
                pl.BlockSpec((block_rows, LANES), lambda i: (i, 0)),
                pl.BlockSpec((block_rows, LANES), lambda i: (i, 0)),
            ],
            out_specs=pl.BlockSpec((8, LANES), lambda i: (i, 0)),
        ),
        compiler_params=pltpu.CompilerParams(
            dimension_semantics=("parallel",),
        ),
    )(pred2, true2)

    # Tiny final reduction (num_blocks*8*128 elems) + mean in plain JAX.
    return jnp.sum(partial, dtype=jnp.float32) / jnp.float32(total_n)


def _focal_loss_ref(pred, true, gamma=GAMMA, alpha=ALPHA):
    x = pred.astype(jnp.float32)
    y = true.astype(jnp.float32)
    bce = jnp.maximum(x, 0.0) - x * y + jnp.log1p(jnp.exp(-jnp.abs(x)))
    prob = jax.nn.sigmoid(x)
    p_t = y * prob + (1.0 - y) * (1.0 - prob)
    alpha_factor = y * alpha + (1.0 - y) * (1.0 - alpha)
    loss = bce * alpha_factor * (1.0 - p_t) ** gamma
    return jnp.mean(loss)


if __name__ == "__main__":
    key = jax.random.PRNGKey(0)
    k1, k2 = jax.random.split(key)
    # NCHW, same shape for pred (logits) and true (targets in [0,1]).
    B, C, H, W = 2, 4, 16, 16
    pred = jax.random.normal(k1, (B, C, H, W), dtype=jnp.float32) * 2.0
    true = (jax.random.uniform(k2, (B, C, H, W)) > 0.7).astype(jnp.float32)

    out = focal_loss(pred, true)
    out = jax.block_until_ready(out)

    ref = _focal_loss_ref(pred, true)
    # Slightly looser tolerance: kernel uses EUP approx reciprocal for sigmoid.
    assert jnp.allclose(out, ref, atol=1e-6, rtol=1e-3), (out, ref)
    print("KERNEL_OK")
</pallas_src>

<mosaic_0001>
module attributes {stable_mosaic.version = 11 : i64} {
  func.func @_focal_loss_kernel(%arg0: i32, %arg1: memref<16x128xf32, #tpu.memory_space<vmem>>, %arg2: memref<16x128xf32, #tpu.memory_space<vmem>>, %arg3: memref<8x128xf32, #tpu.memory_space<vmem>>) attributes {dimension_semantics = [#tpu.dimension_semantics<parallel>], iteration_bounds = array<i64: 1>, scalar_prefetch = 0 : i64, scratch_operands = 0 : i64, tpu.core_type = #tpu.core_type<tc>, window_params = [{transform_indices = @transform_0, window_bounds = array<i64: 16, 128>}, {transform_indices = @transform_1, window_bounds = array<i64: 16, 128>}, {transform_indices = @transform_2, window_bounds = array<i64: 8, 128>}]} {
    %c0 = arith.constant 0 : index
    %c0_0 = arith.constant 0 : index
    %0 = vector.load %arg1[%c0, %c0_0] : memref<16x128xf32, #tpu.memory_space<vmem>>, vector<16x128xf32>
    %c0_1 = arith.constant 0 : index
    %c0_2 = arith.constant 0 : index
    %1 = vector.load %arg2[%c0_1, %c0_2] : memref<16x128xf32, #tpu.memory_space<vmem>>, vector<16x128xf32>
    %cst = arith.constant 1.000000e+00 : f32
    %2 = vector.broadcast %cst : f32 to vector<16x128xf32>
    %3 = arith.subf %2, %1 : vector<16x128xf32>
    %4 = math.absf %0 : vector<16x128xf32>
    %cst_3 = arith.constant 0.000000e+00 : f32
    %5 = vector.broadcast %cst_3 : f32 to vector<16x128xf32>
    %6 = arith.subf %5, %4 : vector<16x128xf32>
    %7 = math.exp %6 : vector<16x128xf32>
    %cst_4 = arith.constant 0.000000e+00 : f32
    %8 = vector.broadcast %cst_4 : f32 to vector<16x128xf32>
    %9 = arith.maximumf %0, %8 : vector<16x128xf32>
    %10 = arith.mulf %0, %1 : vector<16x128xf32>
    %11 = arith.subf %9, %10 : vector<16x128xf32>
    %12 = math.log1p %7 : vector<16x128xf32>
    %13 = arith.addf %11, %12 : vector<16x128xf32>
    %cst_5 = arith.constant 1.000000e+00 : f32
    %14 = vector.broadcast %cst_5 : f32 to vector<16x128xf32>
    %15 = arith.addf %14, %7 : vector<16x128xf32>
    %16 = tpu.reciprocal %15 {approx = true} : vector<16x128xf32> -> vector<16x128xf32>
    %cst_6 = arith.constant 0.000000e+00 : f32
    %17 = vector.broadcast %cst_6 : f32 to vector<16x128xf32>
    %18 = arith.cmpf oge, %0, %17 : vector<16x128xf32>
    %cst_7 = arith.constant 1.000000e+00 : f32
    %19 = vector.broadcast %cst_7 : f32 to vector<16x128xf32>
    %20 = arith.select %18, %19, %7 : vector<16x128xi1>, vector<16x128xf32>
    %21 = arith.mulf %20, %16 : vector<16x128xf32>
    %22 = arith.mulf %1, %21 : vector<16x128xf32>
    %cst_8 = arith.constant 1.000000e+00 : f32
    %23 = vector.broadcast %cst_8 : f32 to vector<16x128xf32>
    %24 = arith.subf %23, %21 : vector<16x128xf32>
    %25 = arith.mulf %3, %24 : vector<16x128xf32>
    %26 = arith.addf %22, %25 : vector<16x128xf32>
    %cst_9 = arith.constant 2.500000e-01 : f32
    %27 = vector.broadcast %cst_9 : f32 to vector<16x128xf32>
    %28 = arith.mulf %1, %27 : vector<16x128xf32>
    %cst_10 = arith.constant 7.500000e-01 : f32
    %29 = vector.broadcast %cst_10 : f32 to vector<16x128xf32>
    %30 = arith.mulf %3, %29 : vector<16x128xf32>
    %31 = arith.addf %28, %30 : vector<16x128xf32>
    %cst_11 = arith.constant 1.000000e+00 : f32
    %32 = vector.broadcast %cst_11 : f32 to vector<16x128xf32>
    %33 = arith.subf %32, %26 : vector<16x128xf32>
    %cst_12 = arith.constant 0.000000e+00 : f32
    %34 = vector.broadcast %cst_12 : f32 to vector<16x128xf32>
    %35 = arith.maximumf %33, %34 : vector<16x128xf32>
    %36 = math.sqrt %35 : vector<16x128xf32>
    %37 = arith.mulf %35, %36 : vector<16x128xf32>
    %38 = arith.mulf %13, %31 : vector<16x128xf32>
    %39 = arith.mulf %38, %37 : vector<16x128xf32>
    %40 = vector.shape_cast %39 : vector<16x128xf32> to vector<2x8x128xf32>
    %cst_13 = arith.constant dense<0.000000e+00> : vector<8x128xf32>
    %41 = vector.multi_reduction <add>, %40, %cst_13 [0] : vector<2x8x128xf32> to vector<8x128xf32>
    %c0_14 = arith.constant 0 : index
    %c0_15 = arith.constant 0 : index
    %42 = vector.load %arg3[%c0_14, %c0_15] : memref<8x128xf32, #tpu.memory_space<vmem>>, vector<8x128xf32>
    tpu.vector_store %arg3[%c0_14, %c0_15], %41 {strides = array<i32>} : memref<8x128xf32, #tpu.memory_space<vmem>>, vector<8x128xf32>,
    return
  }
  func.func @transform_0(%arg0: i32) -> (i32, i32) {
    %c0_i32 = arith.constant 0 : i32
    %c0_i32_0 = arith.constant 0 : i32
    return %arg0, %c0_i32 : i32, i32
  }
  func.func @transform_1(%arg0: i32) -> (i32, i32) {
    %c0_i32 = arith.constant 0 : i32
    %c0_i32_0 = arith.constant 0 : i32
    return %arg0, %c0_i32 : i32, i32
  }
  func.func @transform_2(%arg0: i32) -> (i32, i32) {
    %c0_i32 = arith.constant 0 : i32
    %c0_i32_0 = arith.constant 0 : i32
    return %arg0, %c0_i32 : i32, i32
  }
}

</mosaic_0001>

<bundles_post_ra>
// kernel: tpu_custom_call.1
= control target key start
LH: loop header
LB: loop body
LE: loop exit
PB: predicated region body
PF: predicated region fallthrough
CT: control target
= control target key end

     0   :  { %7 = vsyncpa [#allocation3], 0  ;;  %s274_s0 = inlined_call_operand.hbm [shape: f32[16,128], index: 0, kind: input, shape index: {}]   ;;  %s275_s1 = inlined_call_operand.hbm [shape: f32[16,128], index: 1, kind: input, shape index: {}]   ;;  %s276_s2 = inlined_call_operand.hbm [shape: f32[8,128], index: 2, kind: output, shape index: {}]  }
   0x1   :  { %8 = vsyncpa [#allocation6], 0 }
   0x2   :  { %9 = vsyncpa [#allocation4], 0  ;;  %s233_s9 = smov [#allocation2]  }
   0x3   :  { %s15_s10 = sshll.u32 %s233_s9, 4  ;;  %s16_s10 = int_to_ptr.vmem [resolvable:$true] %s15_s10 }
   0x4   :  { %s175_s11 = scalar_lea.vmem %s16_s10, 256  ;;  %p180_p1 = scmp.lt.s32.totalorder %s16_s10, %s16_s10 }
   0x5   :  { %p176_p0 = scmp.ne.s32.totalorder %s16_s10, %s175_s11  ;;  %p181_p2 = scmp.lt.s32.totalorder %s175_s11, %s175_s11 }
   0x7   :  { %p182_p3 = por %p181_p2, %p180_p1 }
   0x9   :  { %p183_p4 = pnand %p182_p3, %p176_p0 }
   0xb   :  { %186 = shalt.err (!%p183_p4)
}
   0xc   :  { %s234_s12 = smov 128   ;;  %s235_s13 = smov 8  }
   0xd   :  { %21 = dma.hbm_to_vmem [thread:$0]  %s274_s0, 256, %s16_s10, [#allocation3], %s234_s12, %s234_s12, %s235_s13  }
   0xe   :  { %s236_s16 = smov [#allocation5]  }
   0xf   :  { %s27_s17 = sshll.u32 %s236_s16, 4  ;;  %s28_s17 = int_to_ptr.vmem [resolvable:$true] %s27_s17 }
  0x10   :  { %s195_s18 = scalar_lea.vmem %s28_s17, 256  ;;  %p200_p6 = scmp.lt.s32.totalorder %s28_s17, %s28_s17 }
  0x11   :  { %p196_p5 = scmp.ne.s32.totalorder %s28_s17, %s195_s18  ;;  %p201_p7 = scmp.lt.s32.totalorder %s195_s18, %s195_s18 }
  0x13   :  { %p202_p8 = por %p201_p7, %p200_p6 }
  0x15   :  { %p203_p9 = pnand %p202_p8, %p196_p5 }
  0x17   :  { %206 = shalt.err (!%p203_p9)
}
  0x18   :  { %33 = dma.hbm_to_vmem [thread:$0]  %s275_s1, 256, %s28_s17, [#allocation6], %s234_s12, %s234_s12, %s235_s13  }
  0x19   :  { %227 = dma.done.wait [#allocation3], 256  }
  0x1a   :  { %228 = vsyncadd [#allocation3], 4294967040 }
  0x1b   :  { %229 = dma.done.wait [#allocation6], 256  }
  0x1c   :  { %230 = vsyncadd [#allocation6], 4294967040  ;;  %v259_v0 = vld [vmem:[#allocation2] sm:$0xff]  ;;  %v261_v1 = vld [vmem:[#allocation2 + $0x8] sm:$0xff]  ;;  %s237_s0 = smov [#allocation7]  }
  0x1d   :  { %v46_v2 = vand.u32 2147483647, %v259_v0  ;;  %v47_v3 = vand.u32 2147483647, %v261_v1  ;;  %vm84_vm0 = vcmp.ge.f32.partialorder %v259_v0, 0.0  ;;  %vm85_vm1 = vcmp.ge.f32.partialorder %v261_v1, 0.0 }
  0x1e   :  { %v42_v12 = vld [vmem:[#allocation5] sm:$0xff]  ;;  %v43_v14 = vld [vmem:[#allocation5 + $0x8] sm:$0xff]  ;;  %v54_v42 = vmax.f32 %v259_v0, 0.0  ;;  %v55_v44 = vmax.f32 %v261_v1, 0.0  ;;  %s136_s1 = sshll.u32 %s237_s0, 4  ;;  %s137_s1 = int_to_ptr.vmem [resolvable:$true] %s136_s1 }
  0x1f   :  { %v48_v4 = vsub.f32 0.0, %v46_v2  ;;  %v49_v5 = vsub.f32 0.0, %v47_v3  ;;  %v44_v18 = vsub.f32 1.0, %v42_v12  ;;  %v45_v20 = vsub.f32 1.0, %v43_v14  ;;  %s207_s21 = scalar_lea.vmem %s137_s1, 128  ;;  %p212_p11 = scmp.lt.s32.totalorder %s137_s1, %s137_s1 }
  0x20   :  { %v56_v43 = vmul.f32 %v42_v12, %v259_v0  ;;  %v57_v45 = vmul.f32 %v43_v14, %v261_v1  ;;  %v98_v51 = vmul.f32 0.25, %v42_v12  ;;  %v99_v55 = vmul.f32 0.25, %v43_v14  ;;  %p208_p10 = scmp.ne.s32.totalorder %s137_s1, %s207_s21  ;;  %p213_p12 = scmp.lt.s32.totalorder %s207_s21, %s207_s21 }
  0x21   :  { %v50_v6 = vmul.f32 1.442695, %v48_v4  ;;  %v52_v7 = vmul.f32 1.442695, %v49_v5  ;;  %v100_v52 = vmul.f32 0.75, %v44_v18  ;;  %v101_v56 = vmul.f32 0.75, %v45_v20 }
  0x22   :  { %v58_v50 = vsub.f32 %v54_v42, %v56_v43  ;;  %v59_v53 = vsub.f32 %v55_v44, %v57_v45  ;;  %p214_p13 = por %p213_p12, %p212_p11 }
  0x23   :  { %151 = vpow2.f32 %v50_v6  ;;  %v102_v59 = vadd.f32 %v100_v52, %v98_v51  ;;  %v103_v62 = vadd.f32 %v101_v56, %v99_v55 }
  0x24   :  { %153 = vpow2.f32 %v52_v7  ;;  %p215_p0 = pnand %p214_p13, %p208_p10 }
  0x30   :  { %v152_v8 = vpop.eup %151 }
  0x31   :  { %v154_v9 = vpop.eup %153  ;;  %v60_v10 = vadd.f32 1.0, %v152_v8  ;;  %v86_v13 = vsel %vm84_vm0, 1.0, %v152_v8  ;;  %v63_v31 = vmul.f32 -0.5, %v152_v8  ;;  %v66_v38 = vand.u32 2147483647, %v152_v8 }
  0x32   :  { %v69_v11 = vadd.f32 1.0, %v154_v9  ;;  %v87_v15 = vsel %vm85_vm1, 1.0, %v154_v9  ;;  %v72_v33 = vmul.f32 -0.5, %v154_v9  ;;  %v75_v41 = vand.u32 2147483647, %v154_v9 }
  0x33   :  { %155 = vrcp.f32 %v60_v10  ;;  %v64_v36 = vadd.f32 1.0, %v63_v31  ;;  %vm67_vm2 = vcmp.lt.f32.partialorder %v66_v38, 0.0004427343 }
  0x34   :  { %157 = vrcp.f32 %v69_v11  ;;  %v73_v39 = vadd.f32 1.0, %v72_v33  ;;  %vm76_vm3 = vcmp.lt.f32.partialorder %v75_v41, 0.0004427343 }
  0x35   :  { %159 = vlog2.f32 %v60_v10  ;;  %v65_v47 = vmul.f32 %v152_v8, %v64_v36 }
  0x36   :  { %161 = vlog2.f32 %v69_v11  ;;  %v74_v49 = vmul.f32 %v154_v9, %v73_v39 }
  0x40   :  { %v156_v16 = vpop.eup %155 }
  0x41   :  { %v158_v17 = vpop.eup %157  ;;  %v88_v19 = vmul.f32 %v156_v16, %v86_v13 }
  0x42   :  { %v89_v21 = vmul.f32 %v158_v17, %v87_v15  ;;  %v160_v37 = vpop.eup %159 }
  0x43   :  { %v90_v22 = vmul.f32 %v88_v19, %v42_v12  ;;  %v92_v23 = vsub.f32 1.0, %v88_v19  ;;  %v162_v40 = vpop.eup %161  ;;  %v62_v46 = vmul.f32 0.6931472, %v160_v37 }
  0x44   :  { %v91_v24 = vmul.f32 %v89_v21, %v43_v14  ;;  %v93_v25 = vsub.f32 1.0, %v89_v21  ;;  %v71_v48 = vmul.f32 0.6931472, %v162_v40 }
  0x45   :  { %v94_v26 = vmul.f32 %v92_v23, %v44_v18  ;;  %v68_v54 = vsel %vm67_vm2, %v65_v47, %v62_v46 }
  0x46   :  { %v95_v27 = vmul.f32 %v93_v25, %v45_v20  ;;  %v77_v57 = vsel %vm76_vm3, %v74_v49, %v71_v48  ;;  %v78_v58 = vadd.f32 %v68_v54, %v58_v50 }
  0x47   :  { %v96_v28 = vadd.f32 %v94_v26, %v90_v22  ;;  %v79_v61 = vadd.f32 %v77_v57, %v59_v53 }
  0x48   :  { %v97_v29 = vadd.f32 %v95_v27, %v91_v24  ;;  %v124_v5 = vmul.f32 %v102_v59, %v78_v58 }
  0x49   :  { %v104_v30 = vsub.f32 1.0, %v96_v28  ;;  %v125_v8 = vmul.f32 %v103_v62, %v79_v61 }
  0x4a   :  { %v105_v32 = vsub.f32 1.0, %v97_v29 }
  0x4b   :  { %v106_v34 = vmax.f32 %v104_v30, 0.0 }
  0x4c   :  { %v107_v35 = vmax.f32 %v105_v32, 0.0 }
  0x4d   :  { %163 = vrsqrt.f32 %v106_v34  ;;  %vm110_vm4 = vcmp.eq.f32.partialorder %v106_v34, inf  ;;  %v113_v63 = vand.u32 2147483648, %v106_v34  ;;  %vm112_vm5 = vcmp.eq.f32.partialorder %v106_v34, 0.0 }
  0x4e   :  { %165 = vrsqrt.f32 %v107_v35  ;;  %vm117_vm6 = vcmp.eq.f32.partialorder %v107_v35, inf  ;;  %v120_v2 = vand.u32 2147483648, %v107_v35  ;;  %vm119_vm7 = vcmp.eq.f32.partialorder %v107_v35, 0.0 }
  0x5a   :  { %v164_v60 = vpop.eup %163 }
  0x5b   :  { %v166_v0 = vpop.eup %165  ;;  %v109_v1 = vmul.f32 %v164_v60, %v106_v34 }
  0x5c   :  { %v116_v3 = vmul.f32 %v166_v0, %v107_v35 }
  0x5d   :  { %v111_v4 = vsel %vm110_vm4, %v106_v34, %v109_v1 }
  0x5e   :  { %v114_v6 = vsel %vm112_vm5, %v113_v63, %v111_v4  ;;  %v118_v7 = vsel %vm117_vm6, %v107_v35, %v116_v3 }
  0x5f   :  { %v121_v9 = vsel %vm119_vm7, %v120_v2, %v118_v7  ;;  %v122_v10 = vmul.f32 %v114_v6, %v106_v34 }
  0x60   :  { %v123_v11 = vmul.f32 %v121_v9, %v107_v35 }
  0x61   :  { %v126_v12 = vmul.f32 %v124_v5, %v122_v10 }
  0x62   :  { %v127_v13 = vmul.f32 %v125_v8, %v123_v11 }
  0x64   :  { %v128_v14 = vadd.f32 %v127_v13, %v126_v12 }
  0x66   :  { %129 = vst [vmem:[#allocation7] sm:$0xff] %v128_v14 }
  0x67   :  { %218 = shalt.err (!%p215_p0)
}
  0x68   :  { %139 = dma.vmem_to_hbm [thread:$0]  %s137_s1, 128, %s276_s2, [#allocation4]  }
  0x69   :  { %231 = dma.done.wait [#allocation4], 128  }
  0x6a   :  { %232 = vsyncadd [#allocation4], 4294967168 }
  0x6b   :  { %143 = vsyncpa [#allocation3], 1 }
  0x6c   :  { %144 = vsyncpa [#allocation6], 1 }
  0x6d   :  { %145 = vsyncpa [#allocation4], 1 }

</bundles_post_ra>
